<compile_context>
chip_gen: v6e
topology: v6e:2x2x1
jax: 0.10.0
libtpu: 0.0.40
codegen_flags: <defaults>
</compile_context>

<pallas_src>
import jax
import jax.numpy as jnp
from jax.experimental import pallas as pl
from jax.experimental.pallas import tpu as pltpu


def _patch_attention_kernel(x_ref, p_ref, o_ref):
    # x_ref: (block_rows, cols) lane-dense tile of the flattened (bt*c, h*w) input
    # p_ref: (1, cols) flattened patch matrix (same block every grid step,
    #        broadcasts over block_rows). Multiply on VPU, sigmoid on EUP.
    o_ref[...] = jax.nn.sigmoid(x_ref[...] * p_ref[...]).astype(o_ref.dtype)


def patch_attention_forward(x, patch_matrix, *, target_tile_bytes=2 * 1024 * 1024,
                            max_block_rows=4096):
    """JAX/Pallas equivalent of PatchAttentionLayer.forward.

    x:            (bt, c, h, w)
    patch_matrix: (1, kernel_size, kernel_size2) with kernel_size == h and
                  kernel_size2 == w (required by the module's broadcast).
    returns:      (bt, c, h, w) = sigmoid(x * patch_matrix)
    """
    bt, c, h, w = x.shape
    assert patch_matrix.shape == (1, h, w), (
        "patch_matrix must match spatial dims (kernel_size == h, kernel_size2 == w)")

    n = bt * c
    cols = h * w                       # lane-dense last dim (full extent -> legal
                                       # even if not a multiple of 128)
    x2d = x.reshape(n, cols)
    p2d = patch_matrix.reshape(1, cols)

    itemsize = jnp.dtype(x.dtype).itemsize
    bytes_per_row = cols * itemsize

    # Largest row block that keeps one tile around target_tile_bytes; must be a
    # multiple of 8 (sublane rule); don't over-allocate past the (rounded) n.
    block_rows = max(1, target_tile_bytes // bytes_per_row)
    block_rows = min(block_rows, max_block_rows)
    block_rows = max(8, (block_rows // 8) * 8)
    block_rows = min(block_rows, max(8, ((n + 7) // 8) * 8))

    num_blocks = pl.cdiv(n, block_rows)    # ragged tail is masked by Pallas

    cost = pl.CostEstimate(
        flops=4 * n * cols,                # mul + a few VPU ops per element
        transcendentals=n * cols,          # one sigmoid (exp) per element
        bytes_accessed=2 * n * cols * itemsize,  # read x + write out (patch ~0)
    )

    # TODO(synk): optionally cast to bf16 at the boundary for ~2x on this
    # purely bandwidth-bound op; kept f32 to match PyTorch semantics exactly.
    out2d = pl.pallas_call(
        _patch_attention_kernel,
        out_shape=jax.ShapeDtypeStruct((n, cols), x.dtype),
        grid=(num_blocks,),
        in_specs=[
            pl.BlockSpec((block_rows, cols), lambda i: (i, 0)),
            pl.BlockSpec((1, cols), lambda i: (0, 0)),
        ],
        out_specs=pl.BlockSpec((block_rows, cols), lambda i: (i, 0)),
        compiler_params=pltpu.CompilerParams(
            dimension_semantics=("parallel",)),
        cost_estimate=cost,
    )(x2d, p2d)

    return out2d.reshape(bt, c, h, w)


if __name__ == "__main__":
    # Small shapes consistent with the module: h == kernel_size, w == kernel_size2
    bt, c, h, w = 2, 4, 16, 16
    key = jax.random.PRNGKey(0)
    k_x, k_p = jax.random.split(key)

    x = jax.random.normal(k_x, (bt, c, h, w), dtype=jnp.float32)
    # deterministic init matching nn.Parameter(torch.randn(1, ks, ks2))
    patch_matrix = jax.random.normal(k_p, (1, h, w), dtype=jnp.float32)

    out = patch_attention_forward(x, patch_matrix)
    out = jax.block_until_ready(out)

    # reference check in plain JAX
    ref = jax.nn.sigmoid(x.reshape(-1, h, w) * patch_matrix).reshape(bt, c, h, w)
    assert out.shape == (bt, c, h, w)
    assert jnp.allclose(out, ref, atol=1e-6), "mismatch vs reference"

    print("KERNEL_OK")
</pallas_src>

<mosaic_0001>
module attributes {stable_mosaic.version = 11 : i64} {
  func.func @_patch_attention_kernel(%arg0: i32, %arg1: memref<8x256xf32, #tpu.memory_space<vmem>>, %arg2: memref<1x256xf32, #tpu.memory_space<vmem>>, %arg3: memref<8x256xf32, #tpu.memory_space<vmem>>) attributes {dimension_semantics = [#tpu.dimension_semantics<parallel>], iteration_bounds = array<i64: 1>, scalar_prefetch = 0 : i64, scratch_operands = 0 : i64, tpu.core_type = #tpu.core_type<tc>, window_params = [{transform_indices = @transform_0, window_bounds = array<i64: 8, 256>}, {pipeline_mode = #tpu.pipeline_mode<synchronous>, transform_indices = @transform_1, window_bounds = array<i64: 1, 256>}, {transform_indices = @transform_2, window_bounds = array<i64: 8, 256>}]} {
    %c0 = arith.constant 0 : index
    %c0_0 = arith.constant 0 : index
    %0 = vector.load %arg1[%c0, %c0_0] : memref<8x256xf32, #tpu.memory_space<vmem>>, vector<8x256xf32>
    %c0_1 = arith.constant 0 : index
    %c0_2 = arith.constant 0 : index
    %1 = vector.load %arg2[%c0_1, %c0_2] : memref<1x256xf32, #tpu.memory_space<vmem>>, vector<1x256xf32>
    %2 = vector.broadcast %1 : vector<1x256xf32> to vector<8x256xf32>
    %3 = arith.mulf %0, %2 : vector<8x256xf32>
    %4 = arith.negf %3 : vector<8x256xf32>
    %5 = math.exp %4 : vector<8x256xf32>
    %cst = arith.constant 1.000000e+00 : f32
    %6 = vector.broadcast %cst : f32 to vector<8x256xf32>
    %7 = arith.addf %6, %5 : vector<8x256xf32>
    %8 = arith.divf %6, %7 : vector<8x256xf32>
    %c0_3 = arith.constant 0 : index
    %c0_4 = arith.constant 0 : index
    %9 = vector.load %arg3[%c0_3, %c0_4] : memref<8x256xf32, #tpu.memory_space<vmem>>, vector<8x256xf32>
    tpu.vector_store %arg3[%c0_3, %c0_4], %8 {strides = array<i32>} : memref<8x256xf32, #tpu.memory_space<vmem>>, vector<8x256xf32>,
    return
  }
  func.func @transform_0(%arg0: i32) -> (i32, i32) {
    %c0_i32 = arith.constant 0 : i32
    %c0_i32_0 = arith.constant 0 : i32
    return %arg0, %c0_i32 : i32, i32
  }
  func.func @transform_1(%arg0: i32) -> (i32, i32) {
    %c0_i32 = arith.constant 0 : i32
    %c0_i32_0 = arith.constant 0 : i32
    %c0_i32_1 = arith.constant 0 : i32
    return %c0_i32, %c0_i32_0 : i32, i32
  }
  func.func @transform_2(%arg0: i32) -> (i32, i32) {
    %c0_i32 = arith.constant 0 : i32
    %c0_i32_0 = arith.constant 0 : i32
    return %arg0, %c0_i32 : i32, i32
  }
}

</mosaic_0001>

<bundles_post_ra>
// kernel: tpu_custom_call.1
= control target key start
LH: loop header
LB: loop body
LE: loop exit
PB: predicated region body
PF: predicated region fallthrough
CT: control target
= control target key end

     0   :  { %7 = vsyncpa [#allocation3], 0  ;;  %s188_s0 = inlined_call_operand.hbm [shape: f32[8,256], index: 0, kind: input, shape index: {}]   ;;  %s189_s1 = inlined_call_operand.hbm [shape: f32[1,256], index: 1, kind: input, shape index: {}]   ;;  %s190_s2 = inlined_call_operand.hbm [shape: f32[8,256], index: 2, kind: output, shape index: {}]  }
   0x1   :  { %8 = vsyncpa [#allocation6], 0 }
   0x2   :  { %9 = vsyncpa [#allocation4], 0  ;;  %s161_s9 = smov [#allocation2]   ;;  %s162_s11 = smov [#allocation5]  }
   0x3   :  { %s16_s10 = sshll.u32 %s161_s9, 4  ;;  %s26_s12 = sshll.u32 %s162_s11, 4  ;;  %s17_s10 = int_to_ptr.vmem [resolvable:$true] %s16_s10  ;;  %s27_s12 = int_to_ptr.vmem [resolvable:$true] %s26_s12 }
   0x4   :  { %s103_s13 = scalar_lea.vmem %s17_s10, 256  ;;  %p108_p1 = scmp.lt.s32.totalorder %s17_s10, %s17_s10 }
   0x5   :  { %p104_p0 = scmp.ne.s32.totalorder %s17_s10, %s103_s13  ;;  %p109_p2 = scmp.lt.s32.totalorder %s103_s13, %s103_s13 }
   0x7   :  { %p110_p3 = por %p109_p2, %p108_p1 }
   0x9   :  { %p111_p4 = pnand %p110_p3, %p104_p0 }
   0xb   :  { %114 = shalt.err (!%p111_p4)
}
   0xc   :  { %19 = dma.hbm_to_vmem [thread:$0]  %s188_s0, 256, %s17_s10, [#allocation3]  }
   0xd   :  { %s123_s16 = scalar_lea.vmem %s27_s12, 32  ;;  %p128_p6 = scmp.lt.s32.totalorder %s27_s12, %s27_s12 }
   0xe   :  { %p124_p5 = scmp.ne.s32.totalorder %s27_s12, %s123_s16  ;;  %p129_p7 = scmp.lt.s32.totalorder %s123_s16, %s123_s16 }
  0x10   :  { %p130_p8 = por %p129_p7, %p128_p6 }
  0x12   :  { %p131_p9 = pnand %p130_p8, %p124_p5 }
  0x14   :  { %134 = shalt.err (!%p131_p9)
}
  0x15   :  { %29 = dma.hbm_to_vmem [thread:$0]  %s189_s1, 32, %s27_s12, [#allocation6]  }
  0x16   :  { %155 = dma.done.wait [#allocation3], 256  }
  0x17   :  { %156 = vsyncadd [#allocation3], 4294967040 }
  0x18   :  { %157 = dma.done.wait [#allocation6], 32  }
  0x19   :  { %158 = vsyncadd [#allocation6], 4294967264  ;;  %v40_v0 = vlaneseq  ;;  %v36_v4 = vld [vmem:[#allocation2] sm:$0xff]  ;;  %v38_v5 = vld [vmem:[#allocation5] sm:$0x3]  ;;  %s163_s0 = smov [#allocation7]  }
  0x1a   :  { %v37_v6 = vld [vmem:[#allocation2 + $0x8] sm:$0xff]  ;;  %s72_s1 = sshll.u32 %s163_s0, 4  ;;  %s73_s1 = int_to_ptr.vmem [resolvable:$true] %s72_s1 }
  0x1b   :  { %v41_v1 = vshrl.u32 %v40_v0, 7  ;;  %s135_s19 = scalar_lea.vmem %s73_s1, 256  ;;  %p140_p11 = scmp.lt.s32.totalorder %s73_s1, %s73_s1 }
  0x1c   :  { %p136_p10 = scmp.ne.s32.totalorder %s73_s1, %s135_s19  ;;  %p141_p12 = scmp.lt.s32.totalorder %s135_s19, %s135_s19 }
  0x1d   :  { %v42_v2 = vsub.s32 0, %v41_v1  ;;  %v46_v3 = vsub.s32 1, %v41_v1 }
  0x1e   :  { %p142_p13 = por %p141_p12, %p140_p11 }
  0x1f   :  { %v43_v7 = vrot.slane %v38_v5, %v42_v2  ;;  %v47_v8 = vrot.slane %v38_v5, %v46_v3 }
  0x20   :  { %p143_p0 = pnand %p142_p13, %p136_p10 }
  0x21   :  { %v50_v9 = vmul.f32 %v43_v7, %v36_v4  ;;  %v51_v10 = vmul.f32 %v47_v8, %v37_v6 }
  0x23   :  { %v82_v11 = vmul.f32 -1.442695, %v50_v9  ;;  %v83_v12 = vmul.f32 -1.442695, %v51_v10 }
  0x25   :  { %87 = vpow2.f32 %v82_v11 }
  0x26   :  { %89 = vpow2.f32 %v83_v12 }
  0x32   :  { %v88_v13 = vpop.eup %87 }
  0x33   :  { %v90_v14 = vpop.eup %89  ;;  %v58_v15 = vadd.f32 1.0, %v88_v13 }
  0x34   :  { %v59_v16 = vadd.f32 1.0, %v90_v14 }
  0x35   :  { %91 = vrcp.f32 %v58_v15 }
  0x36   :  { %93 = vrcp.f32 %v59_v16 }
  0x42   :  { %v92_v17 = vpop.eup %91 }
  0x43   :  { %v94_v18 = vpop.eup %93  ;;  %64 = vst [vmem:[#allocation7] sm:$0xff] %v92_v17 }
  0x44   :  { %65 = vst [vmem:[#allocation7 + $0x8] sm:$0xff] %v94_v18 }
  0x45   :  { %146 = shalt.err (!%p143_p0)
}
  0x46   :  { %75 = dma.vmem_to_hbm [thread:$0]  %s73_s1, 256, %s190_s2, [#allocation4]  }
  0x47   :  { %159 = dma.done.wait [#allocation4], 256  }
  0x48   :  { %160 = vsyncadd [#allocation4], 4294967040 }
  0x49   :  { %79 = vsyncpa [#allocation3], 1 }
  0x4a   :  { %80 = vsyncpa [#allocation6], 1 }
  0x4b   :  { %81 = vsyncpa [#allocation4], 1 }

</bundles_post_ra>
